<compile_context>
chip_gen: v7x
topology: tpu7x:2x2x1
jax: 0.10.0
libtpu: 0.0.40
codegen_flags: <defaults>
</compile_context>

<pallas_src>
import jax
import jax.numpy as jnp
import numpy as np
from jax import lax
from jax.experimental import pallas as pl
from jax.experimental.pallas import tpu as pltpu

DCONFIG = dict(
    drop=0.0,                    # dropout p=0 -> identity (eval semantics)
    pre_linear_dims=[32],
    hidden_size=32,
    post_linear_dims=[32],
    mode='classification',
    select_hidden='weighted_sum',
    sample_rate=2,
)

LANE = 128            # lane width: logits/output padded to this for lane-dense stores
NEG_INF_PAD = -1e30   # bias for fake logit columns -> inert in max / logsumexp


def rnn_classifier_kernel(
    feats_ref,                    # (Ts*BT, D)  f32  layer-mixed, subsampled, t-major per batch tile
    vlen_ref,                     # (BT, 1)     i32  valid lengths after subsampling
    w_pre_ref, b_pre_ref,         # (D, Hpre), (1, Hpre)
    wi_ref, bi_ref,               # (Hpre, 3H), (1, 3H)   GRU input gates, columns (r|z|n)
    wh_ref, bh_ref,               # (H, 3H),   (1, 3H)    GRU hidden gates, columns (r|z|n)
    w_post_ref, b_post_ref,       # (H, Hpost), (1, Hpost)
    w_out_ref, b_out_ref,         # (Hpost, Cp), (1, Cp)  class dim padded to LANE, pad bias -1e30
    out_ref,                      # (BT, Cp) f32
):
    bt = vlen_ref.shape[0]
    ts = feats_ref.shape[0] // bt
    H = wh_ref.shape[0]

    # ---- hoisted input-side work: two big matmuls over all Ts*BT rows ---------
    # pre_linears[0] + ReLU (dropout p=0 -> identity)
    x = jnp.maximum(
        jnp.dot(feats_ref[...], w_pre_ref[...], preferred_element_type=jnp.float32)
        + b_pre_ref[...], 0.0)                                          # (Ts*BT, Hpre)
    # input projections of all three GRU gates for every timestep at once;
    # gi stays in vregs (~4 vregs at these sizes) — no VMEM scratch round trip.
    gi = jnp.dot(x, wi_ref[...], preferred_element_type=jnp.float32) + bi_ref[...]

    wh = wh_ref[...]
    bh = bh_ref[...]
    # hoist the length-mask broadcast out of the serial recurrence
    vlen_b = jnp.broadcast_to(vlen_ref[...], (bt, H))                   # (BT, H) i32

    # ---- serial GRU recurrence: only one matmul (h @ Wh_cat) per step ---------
    # Ts is static & tiny -> full unroll (static, sublane-aligned gi slices).
    h = jnp.zeros((bt, H), jnp.float32)
    for t in range(ts):
        gi_t = gi[t * bt:(t + 1) * bt, :]                               # (BT, 3H)
        gh = jnp.dot(h, wh, preferred_element_type=jnp.float32) + bh    # (BT, 3H)
        r = jax.nn.sigmoid(gi_t[:, 0:H] + gh[:, 0:H])
        z = jax.nn.sigmoid(gi_t[:, H:2 * H] + gh[:, H:2 * H])
        n = jnp.tanh(gi_t[:, 2 * H:3 * H] + r * gh[:, 2 * H:3 * H])
        h_new = (1.0 - z) * n + z * h
        # pack_padded_sequence + h_n[-1]: freeze h once t >= valid_length[b]
        h = jnp.where(vlen_b > t, h_new, h)

    # ---- post_linears[0] + ReLU, out linear (lane-dense), LogSoftmax ----------
    h = jnp.maximum(
        jnp.dot(h, w_post_ref[...], preferred_element_type=jnp.float32)
        + b_post_ref[...], 0.0)
    logits = (jnp.dot(h, w_out_ref[...], preferred_element_type=jnp.float32)
              + b_out_ref[...])                                         # (BT, Cp)
    m = jnp.max(logits, axis=-1, keepdims=True)
    lse = jnp.log(jnp.sum(jnp.exp(logits - m), axis=-1, keepdims=True))
    out_ref[...] = logits - m - lse


def prepare_kernel_params(params):
    """One-time layout prep: transposes, GRU gate concatenation (PyTorch order
    r,z,n along 3H), and lane-dense padding of the output head. Call once and
    reuse — avoids re-emitting tiny transpose/reshape XLA ops every forward."""
    C, Hpost = params['w_out'].shape
    cp = max(LANE, -(-C // LANE) * LANE)
    w_out_pad = jnp.pad(jnp.transpose(params['w_out']), ((0, 0), (0, cp - C)))
    b_out_pad = jnp.pad(params['b_out'], (0, cp - C),
                        constant_values=NEG_INF_PAD).reshape(1, cp)
    return dict(
        layer_weight=params['layer_weight'],
        w_pre=jnp.transpose(params['w_pre']),      # (D, Hpre)
        b_pre=params['b_pre'].reshape(1, -1),
        wi=jnp.transpose(params['w_ih']),          # (Hpre, 3H)
        bi=params['b_ih'].reshape(1, -1),
        wh=jnp.transpose(params['w_hh']),          # (H, 3H)
        bh=params['b_hh'].reshape(1, -1),
        w_post=jnp.transpose(params['w_post']),    # (H, Hpost)
        b_post=params['b_post'].reshape(1, -1),
        w_out=w_out_pad,                           # (Hpost, Cp)
        b_out=b_out_pad,                           # (1, Cp)
        class_num=int(C),
    )


def rnn_classifier_forward(features, valid_lengths, kparams, dconfig):
    """features: (B, L, T, D) f32; valid_lengths: (B,) int (sorted descending)."""
    B, L, T, D = features.shape
    sr = dconfig['sample_rate']
    C = kparams['class_num']
    Cp = kparams['w_out'].shape[1]

    # Glue (plain XLA). Subsample BEFORE the layer weighted-sum: halves the HBM
    # bytes / FLOPs of the prologue einsum with identical math.
    feats_sub = features[:, :, ::sr, :].astype(jnp.float32)        # (B, L, Ts, D)
    lw = kparams['layer_weight'][:L]
    feats = jnp.einsum('l,bltd->btd', lw, feats_sub)               # (B, Ts, D)
    Ts = feats.shape[1]
    # TODO(synk): floor division mirrors the JAX reference; verify floor vs round
    # semantics of `valid_lengths /= sample_rate` for odd lengths in the torch code.
    vlen = (valid_lengths // sr).astype(jnp.int32)

    # Batch tiling: pad to a sublane multiple; a batch grid axis exists so that
    # at non-trivial batch (grid > 1) work shards across v7x's two TensorCores;
    # at this tiny batch it degenerates to grid=(1,).
    BT = min(128, -(-B // 8) * 8)
    Bp = -(-B // BT) * BT
    nb = Bp // BT

    feats = jnp.pad(feats, ((0, Bp - B), (0, 0), (0, 0)))          # (Bp, Ts, D)
    # Per batch-tile, t-major flattening so the hoisted projections are a single
    # (Ts*BT, D) matmul inside the kernel (no in-kernel reshape needed).
    feats_k = feats.reshape(nb, BT, Ts, D).transpose(0, 2, 1, 3).reshape(nb, Ts * BT, D)
    vlen = jnp.pad(vlen, (0, Bp - B)).reshape(Bp, 1)

    def rep2(arr):   # replicated 2-D weight/bias block (full array every tile)
        return pl.BlockSpec(arr.shape, lambda i: (0, 0))

    out = pl.pallas_call(
        rnn_classifier_kernel,
        out_shape=jax.ShapeDtypeStruct((Bp, Cp), jnp.float32),
        grid=(nb,),
        in_specs=[
            pl.BlockSpec((None, Ts * BT, D), lambda i: (i, 0, 0)),
            pl.BlockSpec((BT, 1), lambda i: (i, 0)),
            rep2(kparams['w_pre']), rep2(kparams['b_pre']),
            rep2(kparams['wi']), rep2(kparams['bi']),
            rep2(kparams['wh']), rep2(kparams['bh']),
            rep2(kparams['w_post']), rep2(kparams['b_post']),
            rep2(kparams['w_out']), rep2(kparams['b_out']),
        ],
        out_specs=pl.BlockSpec((BT, Cp), lambda i: (i, 0)),
        compiler_params=pltpu.CompilerParams(dimension_semantics=("parallel",)),
        # TODO(synk): at production Ts, stream Ts chunks via BlockSpec sized for
        # v7x's 64 MiB VMEM and switch the unrolled recurrence to lax.fori_loop
        # with a small unroll factor; consider bf16 MXU operands once matmuls
        # are big enough to be MXU-bound.
    )(
        feats_k, vlen,
        kparams['w_pre'], kparams['b_pre'],
        kparams['wi'], kparams['bi'],
        kparams['wh'], kparams['bh'],
        kparams['w_post'], kparams['b_post'],
        kparams['w_out'], kparams['b_out'],
    )
    return out[:B, :C]


def rnn_classifier_reference(features, valid_lengths, params, dconfig):
    """Pure-JAX reference mirroring the PyTorch forward (labels=None path)."""
    B, L, T, D = features.shape
    w = params['layer_weight'][:L]
    feats = jnp.einsum('l,bltd->btd', w, features)            # weighted_sum
    sr = dconfig['sample_rate']
    feats = feats[:, ::sr, :]
    vlen = valid_lengths // sr
    x = jax.nn.relu(feats @ params['w_pre'].T + params['b_pre'])
    H = dconfig['hidden_size']
    Ts = x.shape[1]
    wih, whh, bih, bhh = params['w_ih'], params['w_hh'], params['b_ih'], params['b_hh']

    def step(t, h):
        x_t = x[:, t, :]
        gi = x_t @ wih.T + bih
        gh = h @ whh.T + bhh
        r = jax.nn.sigmoid(gi[:, :H] + gh[:, :H])
        z = jax.nn.sigmoid(gi[:, H:2 * H] + gh[:, H:2 * H])
        n = jnp.tanh(gi[:, 2 * H:] + r * gh[:, 2 * H:])
        h_new = (1.0 - z) * n + z * h
        return jnp.where((vlen > t)[:, None], h_new, h)

    h = lax.fori_loop(0, Ts, step, jnp.zeros((B, H), jnp.float32))
    h = jax.nn.relu(h @ params['w_post'].T + params['b_post'])
    logits = h @ params['w_out'].T + params['b_out']
    return jax.nn.log_softmax(logits, axis=-1)


def init_params(key, input_dim, pre_dim, hidden, post_dim, class_num):
    ks = jax.random.split(key, 10)
    s = 0.2
    return dict(
        layer_weight=jnp.ones((12,), jnp.float32) / 12.0,           # nn.Parameter(ones(12)/12)
        w_pre=s * jax.random.normal(ks[0], (pre_dim, input_dim), jnp.float32),
        b_pre=s * jax.random.normal(ks[1], (pre_dim,), jnp.float32),
        w_ih=s * jax.random.normal(ks[2], (3 * hidden, pre_dim), jnp.float32),
        w_hh=s * jax.random.normal(ks[3], (3 * hidden, hidden), jnp.float32),
        b_ih=s * jax.random.normal(ks[4], (3 * hidden,), jnp.float32),
        b_hh=s * jax.random.normal(ks[5], (3 * hidden,), jnp.float32),
        w_post=s * jax.random.normal(ks[6], (post_dim, hidden), jnp.float32),
        b_post=s * jax.random.normal(ks[7], (post_dim,), jnp.float32),
        w_out=s * jax.random.normal(ks[8], (class_num, post_dim), jnp.float32),
        b_out=s * jax.random.normal(ks[9], (class_num,), jnp.float32),
    )


if __name__ == "__main__":
    B, L, T, D = 2, 12, 8, 32       # batch, layers, seq, feature_dim
    CLASS_NUM = 4

    key = jax.random.PRNGKey(0)
    k_feat, k_par = jax.random.split(key)
    features = jax.random.normal(k_feat, (B, L, T, D), jnp.float32)
    # enforce_sorted=True -> lengths sorted descending
    valid_lengths = jnp.array([8, 6], dtype=jnp.int32)

    params = init_params(
        k_par,
        input_dim=D,
        pre_dim=DCONFIG['pre_linear_dims'][0],
        hidden=DCONFIG['hidden_size'],
        post_dim=DCONFIG['post_linear_dims'][0],
        class_num=CLASS_NUM,
    )
    # One-time kernel-layout prep (transposes / gate concat / lane-dense head).
    kparams = prepare_kernel_params(params)

    # TODO(synk): labels / CrossEntropyLoss / statistic() branch not implemented;
    # only the inference path (labels=None -> log-softmax result) is reproduced.
    out = rnn_classifier_forward(features, valid_lengths, kparams, DCONFIG)
    out = jax.block_until_ready(out)

    ref = jax.block_until_ready(
        rnn_classifier_reference(features, valid_lengths, params, DCONFIG))
    np.testing.assert_allclose(np.asarray(out), np.asarray(ref), rtol=2e-3, atol=2e-3)

    print("KERNEL_OK")
</pallas_src>

<mosaic_0001>
module attributes {stable_mosaic.version = 11 : i64} {
  func.func @rnn_classifier_kernel(%arg0: i32, %arg1: memref<1x32x32xf32, #tpu.memory_space<vmem>>, %arg2: memref<8x1xi32, #tpu.memory_space<vmem>>, %arg3: memref<32x32xf32, #tpu.memory_space<vmem>>, %arg4: memref<1x32xf32, #tpu.memory_space<vmem>>, %arg5: memref<32x96xf32, #tpu.memory_space<vmem>>, %arg6: memref<1x96xf32, #tpu.memory_space<vmem>>, %arg7: memref<32x96xf32, #tpu.memory_space<vmem>>, %arg8: memref<1x96xf32, #tpu.memory_space<vmem>>, %arg9: memref<32x32xf32, #tpu.memory_space<vmem>>, %arg10: memref<1x32xf32, #tpu.memory_space<vmem>>, %arg11: memref<32x128xf32, #tpu.memory_space<vmem>>, %arg12: memref<1x128xf32, #tpu.memory_space<vmem>>, %arg13: memref<8x128xf32, #tpu.memory_space<vmem>>) attributes {dimension_semantics = [#tpu.dimension_semantics<parallel>], iteration_bounds = array<i64: 1>, scalar_prefetch = 0 : i64, scratch_operands = 0 : i64, tpu.core_type = #tpu.core_type<tc>, window_params = [{transform_indices = @transform_0, window_bounds = array<i64: 1, 32, 32>}, {transform_indices = @transform_1, window_bounds = array<i64: 8, 1>}, {pipeline_mode = #tpu.pipeline_mode<synchronous>, transform_indices = @transform_2, window_bounds = array<i64: 32, 32>}, {pipeline_mode = #tpu.pipeline_mode<synchronous>, transform_indices = @transform_3, window_bounds = array<i64: 1, 32>}, {pipeline_mode = #tpu.pipeline_mode<synchronous>, transform_indices = @transform_4, window_bounds = array<i64: 32, 96>}, {pipeline_mode = #tpu.pipeline_mode<synchronous>, transform_indices = @transform_5, window_bounds = array<i64: 1, 96>}, {pipeline_mode = #tpu.pipeline_mode<synchronous>, transform_indices = @transform_6, window_bounds = array<i64: 32, 96>}, {pipeline_mode = #tpu.pipeline_mode<synchronous>, transform_indices = @transform_7, window_bounds = array<i64: 1, 96>}, {pipeline_mode = #tpu.pipeline_mode<synchronous>, transform_indices = @transform_8, window_bounds = array<i64: 32, 32>}, {pipeline_mode = #tpu.pipeline_mode<synchronous>, transform_indices = @transform_9, window_bounds = array<i64: 1, 32>}, {pipeline_mode = #tpu.pipeline_mode<synchronous>, transform_indices = @transform_10, window_bounds = array<i64: 32, 128>}, {pipeline_mode = #tpu.pipeline_mode<synchronous>, transform_indices = @transform_11, window_bounds = array<i64: 1, 128>}, {transform_indices = @transform_12, window_bounds = array<i64: 8, 128>}]} {
    %c0 = arith.constant 0 : index
    %c0_0 = arith.constant 0 : index
    %c0_1 = arith.constant 0 : index
    %0 = vector.load %arg1[%c0, %c0_0, %c0_1] : memref<1x32x32xf32, #tpu.memory_space<vmem>>, vector<1x32x32xf32>
    %1 = vector.shape_cast %0 : vector<1x32x32xf32> to vector<32x32xf32>
    %c0_2 = arith.constant 0 : index
    %c0_3 = arith.constant 0 : index
    %2 = vector.load %arg3[%c0_2, %c0_3] : memref<32x32xf32, #tpu.memory_space<vmem>>, vector<32x32xf32>
    %cst = arith.constant dense<0.000000e+00> : vector<32x32xf32>
    %3 = tpu.matmul %1, %2, %cst {dimension_numbers = #tpu.dot_dimension_numbers<[1], [0], [0], [1], [0, 0, 1, 1], [], []>} : vector<32x32xf32>, vector<32x32xf32>, vector<32x32xf32> -> vector<32x32xf32>
    %c0_4 = arith.constant 0 : index
    %c0_5 = arith.constant 0 : index
    %4 = vector.load %arg4[%c0_4, %c0_5] : memref<1x32xf32, #tpu.memory_space<vmem>>, vector<1x32xf32>
    %5 = vector.broadcast %4 : vector<1x32xf32> to vector<32x32xf32>
    %6 = arith.addf %3, %5 : vector<32x32xf32>
    %cst_6 = arith.constant 0.000000e+00 : f32
    %7 = vector.broadcast %cst_6 : f32 to vector<32x32xf32>
    %8 = arith.maximumf %6, %7 : vector<32x32xf32>
    %c0_7 = arith.constant 0 : index
    %c0_8 = arith.constant 0 : index
    %9 = vector.load %arg5[%c0_7, %c0_8] : memref<32x96xf32, #tpu.memory_space<vmem>>, vector<32x96xf32>
    %cst_9 = arith.constant dense<0.000000e+00> : vector<32x96xf32>
    %10 = tpu.matmul %8, %9, %cst_9 {dimension_numbers = #tpu.dot_dimension_numbers<[1], [0], [0], [1], [0, 0, 1, 1], [], []>} : vector<32x32xf32>, vector<32x96xf32>, vector<32x96xf32> -> vector<32x96xf32>
    %c0_10 = arith.constant 0 : index
    %c0_11 = arith.constant 0 : index
    %11 = vector.load %arg6[%c0_10, %c0_11] : memref<1x96xf32, #tpu.memory_space<vmem>>, vector<1x96xf32>
    %12 = vector.broadcast %11 : vector<1x96xf32> to vector<32x96xf32>
    %13 = arith.addf %10, %12 : vector<32x96xf32>
    %c0_12 = arith.constant 0 : index
    %c0_13 = arith.constant 0 : index
    %14 = vector.load %arg7[%c0_12, %c0_13] : memref<32x96xf32, #tpu.memory_space<vmem>>, vector<32x96xf32>
    %c0_14 = arith.constant 0 : index
    %c0_15 = arith.constant 0 : index
    %15 = vector.load %arg8[%c0_14, %c0_15] : memref<1x96xf32, #tpu.memory_space<vmem>>, vector<1x96xf32>
    %c0_16 = arith.constant 0 : index
    %c0_17 = arith.constant 0 : index
    %16 = vector.load %arg2[%c0_16, %c0_17] : memref<8x1xi32, #tpu.memory_space<vmem>>, vector<8x1xi32>
    %17 = vector.shape_cast %16 : vector<8x1xi32> to vector<8x1xi32>
    %18 = vector.broadcast %17 : vector<8x1xi32> to vector<8x32xi32>
    %cst_18 = arith.constant 0.000000e+00 : f32
    %19 = vector.broadcast %cst_18 : f32 to vector<8x32xf32>
    %20 = vector.extract_strided_slice %13 {offsets = [0, 0], sizes = [8, 96], strides = [1, 1]} : vector<32x96xf32> to vector<8x96xf32>
    %cst_19 = arith.constant dense<0.000000e+00> : vector<8x96xf32>
    %21 = tpu.matmul %19, %14, %cst_19 {dimension_numbers = #tpu.dot_dimension_numbers<[1], [0], [0], [1], [0, 0, 1, 1], [], []>} : vector<8x32xf32>, vector<32x96xf32>, vector<8x96xf32> -> vector<8x96xf32>
    %22 = vector.broadcast %15 : vector<1x96xf32> to vector<8x96xf32>
    %23 = arith.addf %21, %22 : vector<8x96xf32>
    %24 = vector.extract_strided_slice %20 {offsets = [0, 0], sizes = [8, 32], strides = [1, 1]} : vector<8x96xf32> to vector<8x32xf32>
    %25 = vector.extract_strided_slice %23 {offsets = [0, 0], sizes = [8, 32], strides = [1, 1]} : vector<8x96xf32> to vector<8x32xf32>
    %26 = arith.addf %24, %25 : vector<8x32xf32>
    %27 = arith.negf %26 : vector<8x32xf32>
    %28 = math.exp %27 : vector<8x32xf32>
    %cst_20 = arith.constant 1.000000e+00 : f32
    %29 = vector.broadcast %cst_20 : f32 to vector<8x32xf32>
    %30 = arith.addf %29, %28 : vector<8x32xf32>
    %31 = arith.divf %29, %30 : vector<8x32xf32>
    %32 = vector.extract_strided_slice %20 {offsets = [0, 32], sizes = [8, 32], strides = [1, 1]} : vector<8x96xf32> to vector<8x32xf32>
    %33 = vector.extract_strided_slice %23 {offsets = [0, 32], sizes = [8, 32], strides = [1, 1]} : vector<8x96xf32> to vector<8x32xf32>
    %34 = arith.addf %32, %33 : vector<8x32xf32>
    %35 = arith.negf %34 : vector<8x32xf32>
    %36 = math.exp %35 : vector<8x32xf32>
    %cst_21 = arith.constant 1.000000e+00 : f32
    %37 = vector.broadcast %cst_21 : f32 to vector<8x32xf32>
    %38 = arith.addf %37, %36 : vector<8x32xf32>
    %39 = arith.divf %37, %38 : vector<8x32xf32>
    %40 = vector.extract_strided_slice %20 {offsets = [0, 64], sizes = [8, 32], strides = [1, 1]} : vector<8x96xf32> to vector<8x32xf32>
    %41 = vector.extract_strided_slice %23 {offsets = [0, 64], sizes = [8, 32], strides = [1, 1]} : vector<8x96xf32> to vector<8x32xf32>
    %42 = arith.mulf %31, %41 : vector<8x32xf32>
    %43 = arith.addf %40, %42 : vector<8x32xf32>
    %44 = math.tanh %43 : vector<8x32xf32>
    %cst_22 = arith.constant 1.000000e+00 : f32
    %45 = vector.broadcast %cst_22 : f32 to vector<8x32xf32>
    %46 = arith.subf %45, %39 : vector<8x32xf32>
    %47 = arith.mulf %46, %44 : vector<8x32xf32>
    %48 = arith.mulf %39, %19 : vector<8x32xf32>
    %49 = arith.addf %47, %48 : vector<8x32xf32>
    %c0_i32 = arith.constant 0 : i32
    %50 = vector.broadcast %c0_i32 : i32 to vector<8x32xi32>
    %51 = arith.cmpi sgt, %18, %50 : vector<8x32xi32>
    %52 = arith.select %51, %49, %19 : vector<8x32xi1>, vector<8x32xf32>
    %53 = vector.extract_strided_slice %13 {offsets = [8, 0], sizes = [8, 96], strides = [1, 1]} : vector<32x96xf32> to vector<8x96xf32>
    %cst_23 = arith.constant dense<0.000000e+00> : vector<8x96xf32>
    %54 = tpu.matmul %52, %14, %cst_23 {dimension_numbers = #tpu.dot_dimension_numbers<[1], [0], [0], [1], [0, 0, 1, 1], [], []>} : vector<8x32xf32>, vector<32x96xf32>, vector<8x96xf32> -> vector<8x96xf32>
    %55 = vector.broadcast %15 : vector<1x96xf32> to vector<8x96xf32>
    %56 = arith.addf %54, %55 : vector<8x96xf32>
    %57 = vector.extract_strided_slice %53 {offsets = [0, 0], sizes = [8, 32], strides = [1, 1]} : vector<8x96xf32> to vector<8x32xf32>
    %58 = vector.extract_strided_slice %56 {offsets = [0, 0], sizes = [8, 32], strides = [1, 1]} : vector<8x96xf32> to vector<8x32xf32>
    %59 = arith.addf %57, %58 : vector<8x32xf32>
    %60 = arith.negf %59 : vector<8x32xf32>
    %61 = math.exp %60 : vector<8x32xf32>
    %cst_24 = arith.constant 1.000000e+00 : f32
    %62 = vector.broadcast %cst_24 : f32 to vector<8x32xf32>
    %63 = arith.addf %62, %61 : vector<8x32xf32>
    %64 = arith.divf %62, %63 : vector<8x32xf32>
    %65 = vector.extract_strided_slice %53 {offsets = [0, 32], sizes = [8, 32], strides = [1, 1]} : vector<8x96xf32> to vector<8x32xf32>
    %66 = vector.extract_strided_slice %56 {offsets = [0, 32], sizes = [8, 32], strides = [1, 1]} : vector<8x96xf32> to vector<8x32xf32>
    %67 = arith.addf %65, %66 : vector<8x32xf32>
    %68 = arith.negf %67 : vector<8x32xf32>
    %69 = math.exp %68 : vector<8x32xf32>
    %cst_25 = arith.constant 1.000000e+00 : f32
    %70 = vector.broadcast %cst_25 : f32 to vector<8x32xf32>
    %71 = arith.addf %70, %69 : vector<8x32xf32>
    %72 = arith.divf %70, %71 : vector<8x32xf32>
    %73 = vector.extract_strided_slice %53 {offsets = [0, 64], sizes = [8, 32], strides = [1, 1]} : vector<8x96xf32> to vector<8x32xf32>
    %74 = vector.extract_strided_slice %56 {offsets = [0, 64], sizes = [8, 32], strides = [1, 1]} : vector<8x96xf32> to vector<8x32xf32>
    %75 = arith.mulf %64, %74 : vector<8x32xf32>
    %76 = arith.addf %73, %75 : vector<8x32xf32>
    %77 = math.tanh %76 : vector<8x32xf32>
    %cst_26 = arith.constant 1.000000e+00 : f32
    %78 = vector.broadcast %cst_26 : f32 to vector<8x32xf32>
    %79 = arith.subf %78, %72 : vector<8x32xf32>
    %80 = arith.mulf %79, %77 : vector<8x32xf32>
    %81 = arith.mulf %72, %52 : vector<8x32xf32>
    %82 = arith.addf %80, %81 : vector<8x32xf32>
    %c1_i32 = arith.constant 1 : i32
    %83 = vector.broadcast %c1_i32 : i32 to vector<8x32xi32>
    %84 = arith.cmpi sgt, %18, %83 : vector<8x32xi32>
    %85 = arith.select %84, %82, %52 : vector<8x32xi1>, vector<8x32xf32>
    %86 = vector.extract_strided_slice %13 {offsets = [16, 0], sizes = [8, 96], strides = [1, 1]} : vector<32x96xf32> to vector<8x96xf32>
    %cst_27 = arith.constant dense<0.000000e+00> : vector<8x96xf32>
    %87 = tpu.matmul %85, %14, %cst_27 {dimension_numbers = #tpu.dot_dimension_numbers<[1], [0], [0], [1], [0, 0, 1, 1], [], []>} : vector<8x32xf32>, vector<32x96xf32>, vector<8x96xf32> -> vector<8x96xf32>
    %88 = vector.broadcast %15 : vector<1x96xf32> to vector<8x96xf32>
    %89 = arith.addf %87, %88 : vector<8x96xf32>
    %90 = vector.extract_strided_slice %86 {offsets = [0, 0], sizes = [8, 32], strides = [1, 1]} : vector<8x96xf32> to vector<8x32xf32>
    %91 = vector.extract_strided_slice %89 {offsets = [0, 0], sizes = [8, 32], strides = [1, 1]} : vector<8x96xf32> to vector<8x32xf32>
    %92 = arith.addf %90, %91 : vector<8x32xf32>
    %93 = arith.negf %92 : vector<8x32xf32>
    %94 = math.exp %93 : vector<8x32xf32>
    %cst_28 = arith.constant 1.000000e+00 : f32
    %95 = vector.broadcast %cst_28 : f32 to vector<8x32xf32>
    %96 = arith.addf %95, %94 : vector<8x32xf32>
    %97 = arith.divf %95, %96 : vector<8x32xf32>
    %98 = vector.extract_strided_slice %86 {offsets = [0, 32], sizes = [8, 32], strides = [1, 1]} : vector<8x96xf32> to vector<8x32xf32>
    %99 = vector.extract_strided_slice %89 {offsets = [0, 32], sizes = [8, 32], strides = [1, 1]} : vector<8x96xf32> to vector<8x32xf32>
    %100 = arith.addf %98, %99 : vector<8x32xf32>
    %101 = arith.negf %100 : vector<8x32xf32>
    %102 = math.exp %101 : vector<8x32xf32>
    %cst_29 = arith.constant 1.000000e+00 : f32
    %103 = vector.broadcast %cst_29 : f32 to vector<8x32xf32>
    %104 = arith.addf %103, %102 : vector<8x32xf32>
    %105 = arith.divf %103, %104 : vector<8x32xf32>
    %106 = vector.extract_strided_slice %86 {offsets = [0, 64], sizes = [8, 32], strides = [1, 1]} : vector<8x96xf32> to vector<8x32xf32>
    %107 = vector.extract_strided_slice %89 {offsets = [0, 64], sizes = [8, 32], strides = [1, 1]} : vector<8x96xf32> to vector<8x32xf32>
    %108 = arith.mulf %97, %107 : vector<8x32xf32>
    %109 = arith.addf %106, %108 : vector<8x32xf32>
    %110 = math.tanh %109 : vector<8x32xf32>
    %cst_30 = arith.constant 1.000000e+00 : f32
    %111 = vector.broadcast %cst_30 : f32 to vector<8x32xf32>
    %112 = arith.subf %111, %105 : vector<8x32xf32>
    %113 = arith.mulf %112, %110 : vector<8x32xf32>
    %114 = arith.mulf %105, %85 : vector<8x32xf32>
    %115 = arith.addf %113, %114 : vector<8x32xf32>
    %c2_i32 = arith.constant 2 : i32
    %116 = vector.broadcast %c2_i32 : i32 to vector<8x32xi32>
    %117 = arith.cmpi sgt, %18, %116 : vector<8x32xi32>
    %118 = arith.select %117, %115, %85 : vector<8x32xi1>, vector<8x32xf32>
    %119 = vector.extract_strided_slice %13 {offsets = [24, 0], sizes = [8, 96], strides = [1, 1]} : vector<32x96xf32> to vector<8x96xf32>
    %cst_31 = arith.constant dense<0.000000e+00> : vector<8x96xf32>
    %120 = tpu.matmul %118, %14, %cst_31 {dimension_numbers = #tpu.dot_dimension_numbers<[1], [0], [0], [1], [0, 0, 1, 1], [], []>} : vector<8x32xf32>, vector<32x96xf32>, vector<8x96xf32> -> vector<8x96xf32>
    %121 = vector.broadcast %15 : vector<1x96xf32> to vector<8x96xf32>
    %122 = arith.addf %120, %121 : vector<8x96xf32>
    %123 = vector.extract_strided_slice %119 {offsets = [0, 0], sizes = [8, 32], strides = [1, 1]} : vector<8x96xf32> to vector<8x32xf32>
    %124 = vector.extract_strided_slice %122 {offsets = [0, 0], sizes = [8, 32], strides = [1, 1]} : vector<8x96xf32> to vector<8x32xf32>
    %125 = arith.addf %123, %124 : vector<8x32xf32>
    %126 = arith.negf %125 : vector<8x32xf32>
    %127 = math.exp %126 : vector<8x32xf32>
    %cst_32 = arith.constant 1.000000e+00 : f32
    %128 = vector.broadcast %cst_32 : f32 to vector<8x32xf32>
    %129 = arith.addf %128, %127 : vector<8x32xf32>
    %130 = arith.divf %128, %129 : vector<8x32xf32>
    %131 = vector.extract_strided_slice %119 {offsets = [0, 32], sizes = [8, 32], strides = [1, 1]} : vector<8x96xf32> to vector<8x32xf32>
    %132 = vector.extract_strided_slice %122 {offsets = [0, 32], sizes = [8, 32], strides = [1, 1]} : vector<8x96xf32> to vector<8x32xf32>
    %133 = arith.addf %131, %132 : vector<8x32xf32>
    %134 = arith.negf %133 : vector<8x32xf32>
    %135 = math.exp %134 : vector<8x32xf32>
    %cst_33 = arith.constant 1.000000e+00 : f32
    %136 = vector.broadcast %cst_33 : f32 to vector<8x32xf32>
    %137 = arith.addf %136, %135 : vector<8x32xf32>
    %138 = arith.divf %136, %137 : vector<8x32xf32>
    %139 = vector.extract_strided_slice %119 {offsets = [0, 64], sizes = [8, 32], strides = [1, 1]} : vector<8x96xf32> to vector<8x32xf32>
    %140 = vector.extract_strided_slice %122 {offsets = [0, 64], sizes = [8, 32], strides = [1, 1]} : vector<8x96xf32> to vector<8x32xf32>
    %141 = arith.mulf %130, %140 : vector<8x32xf32>
    %142 = arith.addf %139, %141 : vector<8x32xf32>
    %143 = math.tanh %142 : vector<8x32xf32>
    %cst_34 = arith.constant 1.000000e+00 : f32
    %144 = vector.broadcast %cst_34 : f32 to vector<8x32xf32>
    %145 = arith.subf %144, %138 : vector<8x32xf32>
    %146 = arith.mulf %145, %143 : vector<8x32xf32>
    %147 = arith.mulf %138, %118 : vector<8x32xf32>
    %148 = arith.addf %146, %147 : vector<8x32xf32>
    %c3_i32 = arith.constant 3 : i32
    %149 = vector.broadcast %c3_i32 : i32 to vector<8x32xi32>
    %150 = arith.cmpi sgt, %18, %149 : vector<8x32xi32>
    %151 = arith.select %150, %148, %118 : vector<8x32xi1>, vector<8x32xf32>
    %c0_35 = arith.constant 0 : index
    %c0_36 = arith.constant 0 : index
    %152 = vector.load %arg9[%c0_35, %c0_36] : memref<32x32xf32, #tpu.memory_space<vmem>>, vector<32x32xf32>
    %cst_37 = arith.constant dense<0.000000e+00> : vector<8x32xf32>
    %153 = tpu.matmul %151, %152, %cst_37 {dimension_numbers = #tpu.dot_dimension_numbers<[1], [0], [0], [1], [0, 0, 1, 1], [], []>} : vector<8x32xf32>, vector<32x32xf32>, vector<8x32xf32> -> vector<8x32xf32>
    %c0_38 = arith.constant 0 : index
    %c0_39 = arith.constant 0 : index
    %154 = vector.load %arg10[%c0_38, %c0_39] : memref<1x32xf32, #tpu.memory_space<vmem>>, vector<1x32xf32>
    %155 = vector.broadcast %154 : vector<1x32xf32> to vector<8x32xf32>
    %156 = arith.addf %153, %155 : vector<8x32xf32>
    %cst_40 = arith.constant 0.000000e+00 : f32
    %157 = vector.broadcast %cst_40 : f32 to vector<8x32xf32>
    %158 = arith.maximumf %156, %157 : vector<8x32xf32>
    %c0_41 = arith.constant 0 : index
    %c0_42 = arith.constant 0 : index
    %159 = vector.load %arg11[%c0_41, %c0_42] : memref<32x128xf32, #tpu.memory_space<vmem>>, vector<32x128xf32>
    %cst_43 = arith.constant dense<0.000000e+00> : vector<8x128xf32>
    %160 = tpu.matmul %158, %159, %cst_43 {dimension_numbers = #tpu.dot_dimension_numbers<[1], [0], [0], [1], [0, 0, 1, 1], [], []>} : vector<8x32xf32>, vector<32x128xf32>, vector<8x128xf32> -> vector<8x128xf32>
    %c0_44 = arith.constant 0 : index
    %c0_45 = arith.constant 0 : index
    %161 = vector.load %arg12[%c0_44, %c0_45] : memref<1x128xf32, #tpu.memory_space<vmem>>, vector<1x128xf32>
    %162 = vector.broadcast %161 : vector<1x128xf32> to vector<8x128xf32>
    %163 = arith.addf %160, %162 : vector<8x128xf32>
    %cst_46 = arith.constant dense<0xFF800000> : vector<8xf32>
    %164 = vector.multi_reduction <maximumf>, %163, %cst_46 [1] : vector<8x128xf32> to vector<8xf32>
    %165 = vector.shape_cast %164 : vector<8xf32> to vector<8x1xf32>
    %166 = vector.broadcast %165 : vector<8x1xf32> to vector<8x128xf32>
    %167 = arith.subf %163, %166 : vector<8x128xf32>
    %168 = math.exp %167 : vector<8x128xf32>
    %cst_47 = arith.constant dense<0.000000e+00> : vector<8xf32>
    %169 = vector.multi_reduction <add>, %168, %cst_47 [1] : vector<8x128xf32> to vector<8xf32>
    %170 = vector.shape_cast %169 : vector<8xf32> to vector<8x1xf32>
    %171 = math.log %170 : vector<8x1xf32>
    %172 = vector.broadcast %165 : vector<8x1xf32> to vector<8x128xf32>
    %173 = arith.subf %163, %172 : vector<8x128xf32>
    %174 = vector.broadcast %171 : vector<8x1xf32> to vector<8x128xf32>
    %175 = arith.subf %173, %174 : vector<8x128xf32>
    %c0_48 = arith.constant 0 : index
    %c0_49 = arith.constant 0 : index
    %176 = vector.load %arg13[%c0_48, %c0_49] : memref<8x128xf32, #tpu.memory_space<vmem>>, vector<8x128xf32>
    tpu.vector_store %arg13[%c0_48, %c0_49], %175 {strides = array<i32>} : memref<8x128xf32, #tpu.memory_space<vmem>>, vector<8x128xf32>,
    return
  }
  func.func @transform_0(%arg0: i32) -> (i32, i32, i32) {
    %c0_i32 = arith.constant 0 : i32
    %c0_i32_0 = arith.constant 0 : i32
    %c0_i32_1 = arith.constant 0 : i32
    return %arg0, %c0_i32, %c0_i32_0 : i32, i32, i32
  }
  func.func @transform_1(%arg0: i32) -> (i32, i32) {
    %c0_i32 = arith.constant 0 : i32
    %c0_i32_0 = arith.constant 0 : i32
    return %arg0, %c0_i32 : i32, i32
  }
  func.func @transform_2(%arg0: i32) -> (i32, i32) {
    %c0_i32 = arith.constant 0 : i32
    %c0_i32_0 = arith.constant 0 : i32
    %c0_i32_1 = arith.constant 0 : i32
    return %c0_i32, %c0_i32_0 : i32, i32
  }
  func.func @transform_3(%arg0: i32) -> (i32, i32) {
    %c0_i32 = arith.constant 0 : i32
    %c0_i32_0 = arith.constant 0 : i32
    %c0_i32_1 = arith.constant 0 : i32
    return %c0_i32, %c0_i32_0 : i32, i32
  }
  func.func @transform_4(%arg0: i32) -> (i32, i32) {
    %c0_i32 = arith.constant 0 : i32
    %c0_i32_0 = arith.constant 0 : i32
    %c0_i32_1 = arith.constant 0 : i32
    return %c0_i32, %c0_i32_0 : i32, i32
  }
  func.func @transform_5(%arg0: i32) -> (i32, i32) {
    %c0_i32 = arith.constant 0 : i32
    %c0_i32_0 = arith.constant 0 : i32
    %c0_i32_1 = arith.constant 0 : i32
    return %c0_i32, %c0_i32_0 : i32, i32
  }
  func.func @transform_6(%arg0: i32) -> (i32, i32) {
    %c0_i32 = arith.constant 0 : i32
    %c0_i32_0 = arith.constant 0 : i32
    %c0_i32_1 = arith.constant 0 : i32
    return %c0_i32, %c0_i32_0 : i32, i32
  }
  func.func @transform_7(%arg0: i32) -> (i32, i32) {
    %c0_i32 = arith.constant 0 : i32
    %c0_i32_0 = arith.constant 0 : i32
    %c0_i32_1 = arith.constant 0 : i32
    return %c0_i32, %c0_i32_0 : i32, i32
  }
  func.func @transform_8(%arg0: i32) -> (i32, i32) {
    %c0_i32 = arith.constant 0 : i32
    %c0_i32_0 = arith.constant 0 : i32
    %c0_i32_1 = arith.constant 0 : i32
    return %c0_i32, %c0_i32_0 : i32, i32
  }
  func.func @transform_9(%arg0: i32) -> (i32, i32) {
    %c0_i32 = arith.constant 0 : i32
    %c0_i32_0 = arith.constant 0 : i32
    %c0_i32_1 = arith.constant 0 : i32
    return %c0_i32, %c0_i32_0 : i32, i32
  }
  func.func @transform_10(%arg0: i32) -> (i32, i32) {
    %c0_i32 = arith.constant 0 : i32
    %c0_i32_0 = arith.constant 0 : i32
    %c0_i32_1 = arith.constant 0 : i32
    return %c0_i32, %c0_i32_0 : i32, i32
  }
  func.func @transform_11(%arg0: i32) -> (i32, i32) {
    %c0_i32 = arith.constant 0 : i32
    %c0_i32_0 = arith.constant 0 : i32
    %c0_i32_1 = arith.constant 0 : i32
    return %c0_i32, %c0_i32_0 : i32, i32
  }
  func.func @transform_12(%arg0: i32) -> (i32, i32) {
    %c0_i32 = arith.constant 0 : i32
    %c0_i32_0 = arith.constant 0 : i32
    return %arg0, %c0_i32 : i32, i32
  }
}

</mosaic_0001>

<bundles_post_ra>
// kernel: tpu_custom_call.1
= control target key start
LH: loop header
LB: loop body
LE: loop exit
PB: predicated region body
PF: predicated region fallthrough
CT: control target
= control target key end

     0   :  { %17 = vsyncpa [#allocation3], 0  ;;  %s1653_s0 = inlined_call_operand.hbm [shape: f32[1,32,32], index: 0, kind: input, shape index: {}]   ;;  %s1654_s1 = inlined_call_operand.vmem [shape: s32[8,1], index: 1, kind: input, shape index: {}]   ;;  %s1655_s2 = inlined_call_operand.hbm [shape: f32[32,32], index: 2, kind: input, shape index: {}]   ;;  %s1656_s3 = inlined_call_operand.vmem [shape: f32[1,32], index: 3, kind: input, shape index: {}]   ;;  %s1657_s4 = inlined_call_operand.hbm [shape: f32[32,96], index: 4, kind: input, shape index: {}]   ;;  %s1658_s5 = inlined_call_operand.vmem [shape: f32[1,96], index: 5, kind: input, shape index: {}]   ;;  %s1659_s6 = inlined_call_operand.hbm [shape: f32[32,96], index: 6, kind: input, shape index: {}]   ;;  %s1660_s7 = inlined_call_operand.vmem [shape: f32[1,96], index: 7, kind: input, shape index: {}]   ;;  %s1661_s8 = inlined_call_operand.vmem [shape: f32[32,32], index: 8, kind: input, shape index: {}]   ;;  %s1662_s9 = inlined_call_operand.vmem [shape: f32[1,32], index: 9, kind: input, shape index: {}]   ;;  %s1663_s10 = inlined_call_operand.hbm [shape: f32[32,128], index: 10, kind: input, shape index: {}]   ;;  %s1664_s11 = inlined_call_operand.vmem [shape: f32[1,128], index: 11, kind: input, shape index: {}]   ;;  %s1665_s12 = inlined_call_operand.hbm [shape: f32[8,128], index: 12, kind: output, shape index: {}]  }
   0x1   :  { %18 = vsyncpa [#allocation6], 0 }
   0x2   :  { %19 = vsyncpa [#allocation9], 0 }
   0x3   :  { %20 = vsyncpa [#allocation4], 0  ;;  %s1357_s21 = smov [#allocation5]   ;;  %s1358_s23 = smov [#allocation8]  }
   0x4   :  { %s40_s22 = sshll.u32 %s1357_s21, 4  ;;  %s68_s24 = sshll.u32 %s1358_s23, 4  ;;  %s41_s22 = int_to_ptr.vmem [resolvable:$true] %s40_s22  ;;  %s1436_s24 = int_to_ptr.vmem [resolvable:$true] %s68_s24 }
   0x5   :  { %s1217_s27 = scalar_lea.hbm %s1655_s2, 512 }
   0x6   :  { %p1218_p0 = scmp.ne.s32.totalorder %s1655_s2, %s1217_s27  ;;  %p1221_p1 = scmp.lt.u32.totalorder %s1217_s27, %s1655_s2 }
   0x8   :  { %p1223_p2 = pnand %p1221_p1, %p1218_p0 }
   0xa   :  { %1226 = shalt.err (!%p1223_p2)
}
   0xb   :  { %s1227_s14 = scalar_lea.vmem %s41_s22, 512  ;;  %p1232_p4 = scmp.lt.s32.totalorder %s41_s22, %s41_s22 }
   0xc   :  { %p1228_p3 = scmp.ne.s32.totalorder %s41_s22, %s1227_s14  ;;  %p1233_p5 = scmp.lt.s32.totalorder %s1227_s14, %s1227_s14 }
   0xe   :  { %p1234_p6 = por %p1233_p5, %p1232_p4 }
  0x10   :  { %p1235_p7 = pnand %p1234_p6, %p1228_p3 }
  0x12   :  { %1238 = shalt.err (!%p1235_p7)
}
  0x13   :  { %s1359_s15 = smov 128   ;;  %s1360_s16 = smov 8  }
  0x14   :  { %46 = dma.hbm_to_vmem [thread:$0]  %s1655_s2, 512, %s41_s22, [#allocation6], %s1359_s15, %s1359_s15, %s1360_s16  }
  0x15   :  { %s1239_s21 = scalar_lea.hbm %s1659_s6, 512 }
  0x16   :  { %p1240_p8 = scmp.ne.s32.totalorder %s1659_s6, %s1239_s21  ;;  %p1243_p9 = scmp.lt.u32.totalorder %s1239_s21, %s1659_s6 }
  0x18   :  { %p1245_p10 = pnand %p1243_p9, %p1240_p8 }
  0x1a   :  { %1248 = shalt.err (!%p1245_p10)
}
  0x1b   :  { %s1249_s28 = scalar_lea.vmem %s1436_s24, 512  ;;  %p1254_p12 = scmp.lt.s32.totalorder %s1436_s24, %s1436_s24 }
  0x1c   :  { %p1250_p11 = scmp.ne.s32.totalorder %s1436_s24, %s1249_s28  ;;  %p1255_p13 = scmp.lt.s32.totalorder %s1249_s28, %s1249_s28 }
  0x1e   :  { %p1256_p0 = por %p1255_p13, %p1254_p12 }
  0x20   :  { %p1257_p1 = pnand %p1256_p0, %p1250_p11 }
  0x22   :  { %1260 = shalt.err (!%p1257_p1)
}
  0x23   :  { %74 = dma.hbm_to_vmem [thread:$0]  %s1659_s6, 512, %s1436_s24, [#allocation9], %s1359_s15, %s1359_s15, %s1360_s16  }
  0x24   :  { %s1361_s29 = smov [#allocation2]   ;;  %s1362_s13 = smov [#allocation7]  }
  0x25   :  { %s26_s30 = sshll.u32 %s1361_s29, 4  ;;  %s54_s14 = sshll.u32 %s1362_s13, 4  ;;  %s27_s30 = int_to_ptr.vmem [resolvable:$true] %s26_s30  ;;  %s1473_s14 = int_to_ptr.vmem [resolvable:$true] %s54_s14 }
  0x26   :  { %s1261_s19 = scalar_lea.hbm %s1653_s0, 512 }
  0x27   :  { %p1262_p2 = scmp.ne.s32.totalorder %s1653_s0, %s1261_s19  ;;  %p1265_p3 = scmp.lt.u32.totalorder %s1261_s19, %s1653_s0 }
  0x29   :  { %p1267_p4 = pnand %p1265_p3, %p1262_p2 }
  0x2b   :  { %1270 = shalt.err (!%p1267_p4)
}
  0x2c   :  { %s1271_s6 = scalar_lea.vmem %s27_s30, 512  ;;  %p1276_p6 = scmp.lt.s32.totalorder %s27_s30, %s27_s30 }
  0x2d   :  { %p1272_p5 = scmp.ne.s32.totalorder %s27_s30, %s1271_s6  ;;  %p1277_p7 = scmp.lt.s32.totalorder %s1271_s6, %s1271_s6 }
  0x2f   :  { %p1278_p8 = por %p1277_p7, %p1276_p6 }
  0x31   :  { %p1279_p9 = pnand %p1278_p8, %p1272_p5 }
  0x33   :  { %1282 = shalt.err (!%p1279_p9)
}
  0x34   :  { %32 = dma.hbm_to_vmem [thread:$0]  %s1653_s0, 512, %s27_s30, [#allocation3], %s1359_s15, %s1359_s15, %s1360_s16  }
  0x35   :  { %s1283_s2 = scalar_lea.hbm %s1657_s4, 512 }
  0x36   :  { %p1284_p10 = scmp.ne.s32.totalorder %s1657_s4, %s1283_s2  ;;  %p1287_p11 = scmp.lt.u32.totalorder %s1283_s2, %s1657_s4 }
  0x38   :  { %p1289_p12 = pnand %p1287_p11, %p1284_p10 }
  0x3a   :  { %1292 = shalt.err (!%p1289_p12)
}
  0x3b   :  { %s1293_s18 = scalar_lea.vmem %s1473_s14, 512  ;;  %p1298_p0 = scmp.lt.s32.totalorder %s1473_s14, %s1473_s14 }
  0x3c   :  { %p1294_p13 = scmp.ne.s32.totalorder %s1473_s14, %s1293_s18  ;;  %p1299_p1 = scmp.lt.s32.totalorder %s1293_s18, %s1293_s18 }
  0x3e   :  { %p1300_p2 = por %p1299_p1, %p1298_p0 }
  0x40   :  { %p1301_p3 = pnand %p1300_p2, %p1294_p13 }
  0x42   :  { %1304 = shalt.err (!%p1301_p3)
}
  0x43   :  { %60 = dma.hbm_to_vmem [thread:$0]  %s1657_s4, 512, %s1473_s14, [#allocation6], %s1359_s15, %s1359_s15, %s1360_s16  }
  0x44   :  { %s1363_s19 = smov [#allocation10]   ;;  %s1305_s25 = scalar_lea.hbm %s1663_s10, 512 }
  0x45   :  { %s86_s20 = sshll.u32 %s1363_s19, 4  ;;  %p1306_p4 = scmp.ne.s32.totalorder %s1663_s10, %s1305_s25  ;;  %s87_s20 = int_to_ptr.vmem [resolvable:$true] %s86_s20 }
  0x46   :  { %p1309_p5 = scmp.lt.u32.totalorder %s1305_s25, %s1663_s10 }
  0x48   :  { %p1311_p6 = pnand %p1309_p5, %p1306_p4 }
  0x4a   :  { %1314 = shalt.err (!%p1311_p6)
}
  0x4b   :  { %s1315_s28 = scalar_lea.vmem %s87_s20, 512  ;;  %p1320_p8 = scmp.lt.s32.totalorder %s87_s20, %s87_s20 }
  0x4c   :  { %p1316_p7 = scmp.ne.s32.totalorder %s87_s20, %s1315_s28  ;;  %p1321_p9 = scmp.lt.s32.totalorder %s1315_s28, %s1315_s28 }
  0x4e   :  { %p1322_p10 = por %p1321_p9, %p1320_p8 }
  0x50   :  { %p1323_p11 = pnand %p1322_p10, %p1316_p7 }
  0x52   :  { %1326 = shalt.err (!%p1323_p11)
}
  0x53   :  { %92 = dma.hbm_to_vmem [thread:$0]  %s1663_s10, 512, %s87_s20, [#allocation9], %s1359_s15, %s1359_s15, %s1360_s16  }
  0x54   :  { %1349 = dma.done.wait [#allocation3], 512  }
  0x55   :  { %1350 = vsyncadd [#allocation3], 4294966784 }
  0x56   :  { %1351 = dma.done.wait [#allocation6], 1024  }
  0x57   :  { %1352 = vsyncadd [#allocation6], 4294966272 }
  0x58   :  { %1353 = dma.done.wait [#allocation9], 1024  }
  0x59   :  { %1354 = vsyncadd [#allocation9], 4294966272  ;;  %vm125_vm0 = vcmask 261120   ;;  %v114_v0 = vld [vmem:[#allocation5] sm:$0xff]  ;;  %v115_v1 = vld [vmem:[#allocation5 + $0x8] sm:$0xff]  ;;  %v1364_v14 = vmov 0.0|0.0  }
  0x5a   :  { %v116_v2 = vld [vmem:[#allocation5 + $0x10] sm:$0xff]  ;;  %v1121_v3 = vpack.c.bf16 %v115_v1, %v114_v0  ;;  %v117_v4 = vld [vmem:[#allocation5 + $0x18] sm:$0xff]  ;;  %v110_v5 = vld [vmem:[#allocation2] sm:$0xff]  ;;  %vm1365_vm1 = vmmov 0   ;;  %v1366_v20 = vmov 0.0   ;;  %v1368_v42 = vmov 0  }
  0x5b   :  { %v1125_v6 = vpack.c.bf16 %v117_v4, %v116_v2  ;;  %1035 = vmatprep.mubr.msk.f32.mxu0 %vm125_vm0, %v110_v5  ;;  %v227_v7 = vld [vmem:[#allocation7] sm:$0xff]  ;;  %v228_v8 = vld [vmem:[#allocation7 + $0x8] sm:$0xff]  ;;  %v112_v15 = vld [vmem:[#allocation2 + $0x10] sm:$0xff]  ;;  %1187 = vset.pattern.permute.xlu1 %v1368_v42 }
  0x5c   :  { %1122 = vmatprep.subr.bf16.mxu0 %v1121_v3  ;;  %v335_v9 = vld [vmem:[#allocation8] sm:$0xff]  ;;  %v336_v10 = vld [vmem:[#allocation8 + $0x8] sm:$0xff]  ;;  %v1129_v11 = vpack.c.bf16 %v228_v8, %v227_v7  ;;  %v337_v16 = vld [vmem:[#allocation8 + $0x10] sm:$0xff]  ;;  %1188 = vset.pattern.permute.xlu0 %v1368_v42 }
  0x5d   :  { %1124 = vmatpush3.bf16.msra.mxu0 %v1121_v3  ;;  %v111_v12 = vld [vmem:[#allocation2 + $0x8] sm:$0xff]  ;;  %v1526_v13 = vpack.c.bf16 %v336_v10, %v335_v9  ;;  %v338_v17 = vld [vmem:[#allocation8 + $0x18] sm:$0xff]  ;;  %v229_v21 = vld [vmem:[#allocation7 + $0x10] sm:$0xff] }
  0x5e   :  { %1126 = vmatprep.subr.bf16.mxu0 %v1125_v6  ;;  %1130 = vmatprep.subr.bf16.mxu1 %v1129_v11  ;;  %v113_v18 = vld [vmem:[#allocation2 + $0x18] sm:$0xff]  ;;  %v1532_v19 = vpack.c.bf16 %v338_v17, %v337_v16  ;;  %v959_v24 = vld [vmem:[%s1656_s3] ss:$0 sm:$0xff]  ;;  %s1367_s3 = smov 64  }
  0x5f   :  { %1132 = vmatpush3.bf16.msra.mxu1 %v1129_v11  ;;  %v230_v22 = vld [vmem:[#allocation7 + $0x18] sm:$0xff]  ;;  %v1555_v35 = vld [vmem:[%s1660_s7] ss:$0 sm:$0xff] }
  0x60   :  { %v1133_v23 = vpack.c.bf16 %v230_v22, %v229_v21  ;;  %v340_v41 = vld [vmem:[%s1654_s1] sm:$0xff]  ;;  %s1369_s1 = smov 96  }
  0x61   :  { %1128 = vmatpush3.bf16.msra.mxu0 %v1125_v6  ;;  %342 = vperm.xlu1 %1187, %v340_v41   ;;  %v964_v43 = vld [vmem:[%s1658_s5] ss:$0 sm:$0xff] }
  0x62   :  { %1137 = vmatprep.subr.bf16.mxu0 %v1364_v14  ;;  %1134 = vmatprep.subr.bf16.mxu1 %v1133_v23 }
  0x63   :  { %1136 = vmatpush3.bf16.msra.mxu1 %v1133_v23 }
  0x64   :  { %1036 = vmatmul.mubr.msk.f32.vlgmr.msra.gmra.mrb[0].mxu0 %vm125_vm0, %v111_v12  ;;  %1143 = vmatprep.subr.bf16.mxu1 %v1364_v14 }
  0x65   :  { %1038 = vmatprep.mubr.msk.f32.mxu0 %vm125_vm0, %v112_v15  ;;  %1139 = vmatpush3.bf16.msra.mxu0 %v1526_v13 }
  0x66   :  { %1140 = vmatprep.subr.bf16.mxu0 %v1364_v14 }
  0x68   :  { %1039 = vmatmul.mubr.msk.f32.gmra.mrb[2].mxu0 %vm125_vm0, %v113_v18 }
  0x69   :  { %1142 = vmatpush3.bf16.msra.mxu0 %v1532_v19  ;;  %1063 = vmatprep.mubr.msk.f32.mxu0 %vm1365_vm1, %v1366_v20 }
  0x6a   :  { %1149 = vmatprep.subr.bf16.mxu0 %v1364_v14 }
  0x6c   :  { %1064 = vmatmul.mubr.f32.vlgmr.msra.gmra.mrb[4].mxu0 %v1366_v20 }
  0x6d   :  { %1151 = vmatpush3.bf16.msra.mxu0 %v1526_v13  ;;  %1085 = vmatprep.mubr.msk.f32.mxu0 %vm1365_vm1, %v1366_v20 }
  0x6e   :  { %1152 = vmatprep.subr.bf16.mxu0 %v1364_v14 }
  0x71   :  { %1154 = vmatpush3.bf16.msra.mxu0 %v1532_v19 }
  0x72   :  { %1161 = vmatprep.subr.bf16.mxu0 %v1364_v14 }
  0xe0   :  { %v1580_v62 = vpop.permute.xlu1 %342 }
  0xe1   :  { %vm449_vm2 = vcmp.gt.s32.totalorder %v1580_v62, 0  ;;  %vm552_vm3 = vcmp.gt.s32.totalorder %v1580_v62, 1  ;;  %vm655_vm4 = vcmp.gt.s32.totalorder %v1580_v62, 2  ;;  %vm758_vm5 = vcmp.gt.s32.totalorder %v1580_v62, 3  ;;  %v979_v62 = vld [vmem:[%s1664_s11] ss:$0 sm:$0xff] }
 0x137   :  { %v1037_v25 = vpop.f32.mrb[0].mxu0 }
 0x138   :  { %v210_v26 = vadd.f32 %v1037_v25, %v959_v24  ;;  %v204_v27 = vpop.f32.mrb[1].mxu0 }
 0x139   :  { %v205_v28 = vadd.f32 %v959_v24, %v204_v27 }
 0x13a   :  { %v224_v31 = vmax.f32 %v210_v26, 0.0 }
 0x13b   :  { %v223_v29 = vmax.f32 %v205_v28, 0.0  ;;  %v1040_v30 = vpop.f32.mrb[2].mxu0 }
 0x13c   :  { %v220_v32 = vadd.f32 %v1040_v30, %v959_v24  ;;  %v214_v33 = vpop.f32.mrb[3].mxu0 }
 0x13d   :  { %1049 = vmatprep.mubr.msk.f32.mxu1 %vm125_vm0, %v223_v29  ;;  %v215_v34 = vadd.f32 %v959_v24, %v214_v33 }
 0x13e   :  { %1050 = vmatmul.mubr.msk.f32.vlgmr.msra.gmra.mrb[0].mxu1 %vm125_vm0, %v224_v31  ;;  %v226_v36 = vmax.f32 %v220_v32, 0.0 }
 0x13f   :  { %v225_v37 = vmax.f32 %v215_v34, 0.0  ;;  %v419_v38 = vpop.f32.mrb[4].mxu0  ;;  %1145 = vmatpush3.bf16.msra.mxu1 %v1526_v13 }
 0x140   :  { %v420_v39 = vadd.f32 %v1555_v35, %v419_v38  ;;  %v1065_v40 = vpop.f32.mrb[5].mxu0  ;;  %1146 = vmatprep.subr.bf16.mxu1 %v1364_v14 }
 0x141   :  { %1052 = vmatprep.mubr.msk.f32.mxu1 %vm125_vm0, %v225_v37 }
 0x142   :  { %1053 = vmatmul.mubr.msk.f32.gmra.mrb[2].mxu1 %vm125_vm0, %v226_v36  ;;  %431 = vrot.lane.b32.xlu0 %v420_v39, %s1367_s3 }
 0x143   :  { %1148 = vmatpush3.bf16.msra.mxu1 %v1532_v19  ;;  %1074 = vmatprep.mubr.msk.f32.mxu1 %vm1365_vm1, %v1366_v20 }
 0x144   :  { %1155 = vmatprep.subr.bf16.mxu1 %v1364_v14 }
 0x1b4   :  { %v432_v56 = vpop.permute.xlu0 %431 }
 0x211   :  { %v1051_v44 = vpop.f32.mrb[0].mxu1 }
 0x212   :  { %v322_v45 = vadd.f32 %v1051_v44, %v964_v43  ;;  %v316_v46 = vpop.f32.mrb[1].mxu1 }
 0x213   :  { %v317_v47 = vadd.f32 %v964_v43, %v316_v46 }
 0x215   :  { %v423_v48 = vadd.f32 %v420_v39, %v317_v47  ;;  %v1054_v49 = vpop.f32.mrb[2].mxu1 }
 0x216   :  { %v1574_v50 = vadd.f32 %v1054_v49, %v964_v43  ;;  %v326_v51 = vpop.f32.mrb[3].mxu1 }
 0x217   :  { %v970_v52 = vmul.f32 -1.442695, %v423_v48  ;;  %v1576_v53 = vadd.f32 %v964_v43, %v326_v51 }
 0x219   :  { %1189 = vpow2.f32 %v970_v52 }
 0x223   :  { %v1190_v54 = vpop.eup %1189 }
 0x224   :  { %v427_v55 = vadd.f32 1.0, %v1190_v54 }
 0x226   :  { %1191 = vrcp.f32 %v427_v55 }
 0x230   :  { %v1192_v57 = vpop.eup %1191 }
 0x231   :  { %v434_v58 = vmul.f32 %v1192_v57, %v432_v56  ;;  %v441_v63 = vsub.f32 1.0, %v1192_v57  ;;  %v447_v1 = vmul.f32 0.0, %v1192_v57 }
 0x233   :  { %436 = vrot.lane.b32.xlu0 %v434_v58, %s1367_s3 }
 0x2a5   :  { %v437_v59 = vpop.permute.xlu0 %436 }
 0x2a6   :  { %v439_v60 = vadd.f32 %v437_v59, %v317_v47 }
 0x2a8   :  { %1193 = vtanh.f32 %v439_v60 }
 0x2b2   :  { %v1194_v61 = vpop.eup %1193 }
 0x2b3   :  { %443 = vrot.lane.b32.xlu1 %v1194_v61, %s1369_s1  ;;  %v761_v61 = vld [vmem:[%s1661_s8 + $0x8] sm:$0xff] }
 0x325   :  { %v444_v0 = vpop.permute.xlu1 %443 }
 0x326   :  { %v446_v2 = vmul.f32 %v444_v0, %v441_v63  ;;  %v762_v63 = vld [vmem:[%s1661_s8 + $0x10] sm:$0xff] }
 0x328   :  { %v448_v3 = vadd.f32 %v447_v1, %v446_v2  ;;  %v763_v1 = vld [vmem:[%s1661_s8 + $0x18] sm:$0xff] }
 0x32a   :  { %v450_v4 = vsel %vm449_vm2, %v448_v3, 0.0  ;;  %v847_v3 = vld [vmem:[#allocation10] sm:$0xff] }
 0x32b   :  { %452 = vrot.lane.b32.xlu0 %v450_v4, %s1369_s1 }
 0x39d   :  { %v453_v5 = vpop.permute.xlu0 %452 }
 0x39e   :  { %1075 = vmatmul.mubr.msk.f32.vlgmr.msra.gmra.mrb[4].mxu1 %vm125_vm0, %v453_v5 }
 0x39f   :  { %1157 = vmatpush3.bf16.msra.mxu1 %v1526_v13  ;;  %1096 = vmatprep.mubr.msk.f32.mxu1 %vm1365_vm1, %v1366_v20 }
 0x3a0   :  { %1158 = vmatprep.subr.bf16.mxu1 %v1364_v14 }
 0x3a3   :  { %1160 = vmatpush3.bf16.msra.mxu1 %v1532_v19 }
 0x3a4   :  { %1167 = vmatprep.subr.bf16.mxu1 %v1364_v14 }
 0x471   :  { %v522_v6 = vpop.f32.mrb[4].mxu1 }
 0x472   :  { %v523_v7 = vadd.f32 %v1555_v35, %v522_v6  ;;  %v1076_v8 = vpop.f32.mrb[5].mxu1 }
 0x474   :  { %534 = vrot.lane.b32.xlu1 %v523_v7, %s1367_s3  ;;  %v526_v9 = vadd.f32 %v523_v7, %v322_v45 }
 0x476   :  { %v972_v10 = vmul.f32 -1.442695, %v526_v9 }
 0x478   :  { %1195 = vpow2.f32 %v972_v10 }
 0x482   :  { %v1196_v11 = vpop.eup %1195 }
 0x483   :  { %v530_v12 = vadd.f32 1.0, %v1196_v11 }
 0x485   :  { %1197 = vrcp.f32 %v530_v12 }
 0x48f   :  { %v1198_v13 = vpop.eup %1197 }
 0x490   :  { %v544_v21 = vsub.f32 1.0, %v1198_v13  ;;  %v550_v23 = vmul.f32 %v1198_v13, %v450_v4 }
 0x4e6   :  { %v535_v15 = vpop.permute.xlu1 %534 }
 0x4e7   :  { %v537_v16 = vmul.f32 %v1198_v13, %v535_v15  ;;  %v849_v13 = vld [vmem:[#allocation10 + $0x10] sm:$0xff]  ;;  %v850_v15 = vld [vmem:[#allocation10 + $0x18] sm:$0xff] }
 0x4e9   :  { %539 = vrot.lane.b32.xlu0 %v537_v16, %s1367_s3  ;;  %v1171_v16 = vpack.c.bf16 %v850_v15, %v849_v13 }
 0x55b   :  { %v540_v17 = vpop.permute.xlu0 %539 }
 0x55c   :  { %v542_v18 = vadd.f32 %v540_v17, %v322_v45 }
 0x55e   :  { %1199 = vtanh.f32 %v542_v18 }
 0x568   :  { %v1200_v19 = vpop.eup %1199 }
 0x569   :  { %546 = vrot.lane.b32.xlu1 %v1200_v19, %s1369_s1 }
 0x5db   :  { %v547_v22 = vpop.permute.xlu1 %546 }
 0x5dc   :  { %v549_v24 = vmul.f32 %v547_v22, %v544_v21 }
 0x5de   :  { %v551_v25 = vadd.f32 %v550_v23, %v549_v24 }
 0x5e0   :  { %v553_v26 = vsel %vm552_vm3, %v551_v25, %v450_v4  ;;  %v848_v4 = vld [vmem:[#allocation10 + $0x8] sm:$0xff] }
 0x5e1   :  { %555 = vrot.lane.b32.xlu0 %v553_v26, %s1369_s1  ;;  %v1168_v5 = vpack.c.bf16 %v848_v4, %v847_v3 }
 0x653   :  { %v556_v27 = vpop.permute.xlu0 %555 }
 0x654   :  { %1086 = vmatmul.mubr.msk.f32.vlgmr.msra.gmra.mrb[6].mxu0 %vm125_vm0, %v556_v27 }
 0x655   :  { %1107 = vmatprep.mubr.msk.f32.mxu0 %vm1365_vm1, %v1366_v20 }
 0x727   :  { %v625_v28 = vpop.f32.mrb[6].mxu0 }
 0x728   :  { %v626_v29 = vadd.f32 %v1555_v35, %v625_v28  ;;  %v1087_v30 = vpop.f32.mrb[7].mxu0 }
 0x72a   :  { %637 = vrot.lane.b32.xlu1 %v626_v29, %s1367_s3  ;;  %v629_v31 = vadd.f32 %v626_v29, %v1576_v53 }
 0x72c   :  { %v974_v32 = vmul.f32 -1.442695, %v629_v31 }
 0x72e   :  { %1201 = vpow2.f32 %v974_v32 }
 0x738   :  { %v1202_v33 = vpop.eup %1201 }
 0x739   :  { %v633_v34 = vadd.f32 1.0, %v1202_v33 }
 0x73b   :  { %1203 = vrcp.f32 %v633_v34 }
 0x745   :  { %v1204_v36 = vpop.eup %1203 }
 0x746   :  { %v647_v42 = vsub.f32 1.0, %v1204_v36  ;;  %v653_v44 = vmul.f32 %v1204_v36, %v553_v26 }
 0x79c   :  { %v638_v37 = vpop.permute.xlu1 %637 }
 0x79d   :  { %v640_v38 = vmul.f32 %v1204_v36, %v638_v37 }
 0x79f   :  { %642 = vrot.lane.b32.xlu0 %v640_v38, %s1367_s3 }
 0x811   :  { %v643_v39 = vpop.permute.xlu0 %642 }
 0x812   :  { %v645_v40 = vadd.f32 %v643_v39, %v1576_v53 }
 0x814   :  { %1205 = vtanh.f32 %v645_v40 }
 0x81e   :  { %v1206_v41 = vpop.eup %1205 }
 0x81f   :  { %649 = vrot.lane.b32.xlu1 %v1206_v41, %s1369_s1 }
 0x891   :  { %v650_v43 = vpop.permute.xlu1 %649 }
 0x892   :  { %v652_v45 = vmul.f32 %v650_v43, %v647_v42 }
 0x894   :  { %v654_v46 = vadd.f32 %v653_v44, %v652_v45 }
 0x896   :  { %v656_v47 = vsel %vm655_vm4, %v654_v46, %v553_v26 }
 0x897   :  { %658 = vrot.lane.b32.xlu0 %v656_v47, %s1369_s1 }
 0x909   :  { %v659_v48 = vpop.permute.xlu0 %658 }
 0x90a   :  { %1097 = vmatmul.mubr.msk.f32.vlgmr.msra.gmra.mrb[6].mxu1 %vm125_vm0, %v659_v48 }
 0x90b   :  { %1118 = vmatprep.mubr.msk.f32.mxu1 %vm1365_vm1, %v1366_v20  ;;  %1169 = vmatpush3.bf16.msra.mxu1 %v1168_v5 }
 0x90c   :  { %1170 = vmatprep.subr.bf16.mxu1 %v1364_v14 }
 0x90f   :  { %1172 = vmatpush3.bf16.msra.mxu1 %v1171_v16 }
 0x9dd   :  { %v728_v49 = vpop.f32.mrb[6].mxu1 }
 0x9de   :  { %v729_v51 = vadd.f32 %v1555_v35, %v728_v49  ;;  %v1098_v52 = vpop.f32.mrb[7].mxu1  ;;  %v760_v35 = vld [vmem:[%s1661_s8] sm:$0xff] }
 0x9df   :  { %v1162_v0 = vpack.c.bf16 %v761_v61, %v760_v35 }
 0x9e0   :  { %740 = vrot.lane.b32.xlu1 %v729_v51, %s1367_s3  ;;  %v732_v53 = vadd.f32 %v729_v51, %v1574_v50 }
 0x9e1   :  { %1163 = vmatpush3.bf16.msra.mxu0 %v1162_v0 }
 0x9e2   :  { %v976_v54 = vmul.f32 -1.442695, %v732_v53  ;;  %1164 = vmatprep.subr.bf16.mxu0 %v1364_v14  ;;  %v977_v14 = vld [vmem:[%s1662_s9] ss:$0 sm:$0xff]  ;;  %s1370_s9 = smov [#allocation11]  }
 0x9e3   :  { %s948_s24 = sshll.u32 %s1370_s9, 4  ;;  %s949_s24 = int_to_ptr.vmem [resolvable:$true] %s948_s24 }
 0x9e4   :  { %1207 = vpow2.f32 %v976_v54  ;;  %s1327_s11 = scalar_lea.vmem %s949_s24, 128  ;;  %p1332_p13 = scmp.lt.s32.totalorder %s949_s24, %s949_s24 }
 0x9e5   :  { %p1328_p12 = scmp.ne.s32.totalorder %s949_s24, %s1327_s11  ;;  %p1333_p0 = scmp.lt.s32.totalorder %s1327_s11, %s1327_s11 }
 0x9e7   :  { %p1334_p1 = por %p1333_p0, %p1332_p13 }
 0x9e9   :  { %p1335_p2 = pnand %p1334_p1, %p1328_p12 }
 0x9ee   :  { %v1208_v55 = vpop.eup %1207 }
 0x9ef   :  { %v736_v56 = vadd.f32 1.0, %v1208_v55 }
 0x9f1   :  { %1209 = vrcp.f32 %v736_v56 }
 0x9fb   :  { %v1210_v57 = vpop.eup %1209 }
 0x9fc   :  { %v750_v6 = vsub.f32 1.0, %v1210_v57  ;;  %v756_v8 = vmul.f32 %v1210_v57, %v656_v47 }
 0xa52   :  { %v741_v58 = vpop.permute.xlu1 %740 }
 0xa53   :  { %v743_v59 = vmul.f32 %v1210_v57, %v741_v58 }
 0xa55   :  { %745 = vrot.lane.b32.xlu0 %v743_v59, %s1367_s3 }
 0xac7   :  { %v746_v60 = vpop.permute.xlu0 %745 }
 0xac8   :  { %v748_v20 = vadd.f32 %v746_v60, %v1574_v50  ;;  %v1165_v50 = vpack.c.bf16 %v763_v1, %v762_v63 }
 0xaca   :  { %1211 = vtanh.f32 %v748_v20  ;;  %1166 = vmatpush3.bf16.msra.mxu0 %v1165_v50 }
 0xad4   :  { %v1212_v2 = vpop.eup %1211 }
 0xad5   :  { %752 = vrot.lane.b32.xlu1 %v1212_v2, %s1369_s1 }
 0xb47   :  { %v753_v7 = vpop.permute.xlu1 %752 }
 0xb48   :  { %v755_v9 = vmul.f32 %v753_v7, %v750_v6 }
 0xb4a   :  { %v757_v10 = vadd.f32 %v756_v8, %v755_v9 }
 0xb4c   :  { %v759_v11 = vsel %vm758_vm5, %v757_v10, %v656_v47 }
 0xb4d   :  { %772 = vrot.lane.b32.xlu0 %v759_v11, %s1369_s1 }
 0xbbf   :  { %v773_v12 = vpop.permute.xlu0 %772 }
 0xbc0   :  { %1108 = vmatmul.mubr.msk.f32.vlgmr.msra.gmra.mrb[8].mxu0 %vm125_vm0, %v773_v12 }
 0xc93   :  { %v842_v17 = vpop.f32.mrb[8].mxu0 }
 0xc94   :  { %v843_v18 = vadd.f32 %v977_v14, %v842_v17  ;;  %v1109_v19 = vpop.f32.mrb[9].mxu0 }
 0xc96   :  { %v846_v21 = vmax.f32 %v843_v18, 0.0 }
 0xc98   :  { %1119 = vmatmul.mubr.msk.f32.vlgmr.msra.gmra.mrb[8].mxu1 %vm125_vm0, %v846_v21 }
 0xd6b   :  { %v927_v22 = vpop.f32.mrb[8].mxu1 }
 0xd6c   :  { %v928_v23 = vadd.f32 %v979_v62, %v927_v22  ;;  %v1120_v24 = vpop.f32.mrb[9].mxu1 }
 0xd6e   :  { %931 = vmax.xlane.f32.xlu1 %v928_v23 }
 0xdfb   :  { %v932_v25 = vpop.xlane.xlu1 %931 }
 0xdfc   :  { %v933_v26 = vsub.f32 %v928_v23, %v932_v25 }
 0xdfe   :  { %v934_v27 = vmul.f32 1.442695, %v933_v26 }
 0xe00   :  { %1213 = vpow2.f32 %v934_v27 }
 0xe0a   :  { %v1214_v28 = vpop.eup %1213 }
 0xe0b   :  { %936 = vadd.xlane.f32.xlu0 %v1214_v28 }
 0xe98   :  { %v937_v29 = vpop.xlane.xlu0 %936 }
 0xe99   :  { %1215 = vlog2.f32 %v937_v29 }
 0xea3   :  { %v1216_v30 = vpop.eup %1215 }
 0xea4   :  { %v939_v31 = vmul.f32 0.6931472, %v1216_v30 }
 0xea6   :  { %v940_v32 = vsub.f32 %v933_v26, %v939_v31 }
 0xea8   :  { %941 = vst [vmem:[#allocation11] sm:$0xff] %v940_v32 }
 0xea9   :  { %1338 = shalt.err (!%p1335_p2)
}
 0xeaa   :  { %s1339_s28 = scalar_lea.hbm %s1665_s12, 128 }
 0xeab   :  { %p1340_p3 = scmp.ne.s32.totalorder %s1665_s12, %s1339_s28  ;;  %p1343_p4 = scmp.lt.u32.totalorder %s1339_s28, %s1665_s12 }
 0xead   :  { %p1345_p5 = pnand %p1343_p4, %p1340_p3 }
 0xeaf   :  { %1348 = shalt.err (!%p1345_p5)
}
 0xeb0   :  { %951 = dma.vmem_to_hbm [thread:$0]  %s949_s24, 128, %s1665_s12, [#allocation4]  }
 0xeb1   :  { %1355 = dma.done.wait [#allocation4], 128  }
 0xeb2   :  { %1356 = vsyncadd [#allocation4], 4294967168 }
 0xeb3   :  { %955 = vsyncpa [#allocation3], 1 }
 0xeb4   :  { %956 = vsyncpa [#allocation6], 1 }
 0xeb5   :  { %957 = vsyncpa [#allocation9], 1 }
 0xeb6   :  { %958 = vsyncpa [#allocation4], 1 }

</bundles_post_ra>
